<compile_context>
chip_gen: v7x
topology: tpu7x:2x2x1
jax: 0.10.0
libtpu: 0.0.40
codegen_flags: <defaults>
</compile_context>

<pallas_src>
import functools

import jax
import jax.numpy as jnp
from jax.experimental import pallas as pl
from jax.experimental.pallas import tpu as pltpu


def _round_up(n, m):
    return ((n + m - 1) // m) * m


def _discrim_kernel(n_layers,
                    x_ref, w_in_ref, b_in_ref, w_hid_ref, b_hid_ref,
                    w_out_ref, b_out_ref, o_ref):
    """Whole-MLP forward for one batch tile; all weights resident in VMEM."""
    # input block: Linear (bf16 operands, f32 accumulate) + (Dropout=id) + ReLU (f32 VPU)
    h = jnp.dot(x_ref[...], w_in_ref[...], preferred_element_type=jnp.float32)
    h = jnp.maximum(h + b_in_ref[...], 0.0)

    def layer(i, h):
        y = jnp.dot(h.astype(w_hid_ref.dtype), w_hid_ref[i],
                    preferred_element_type=jnp.float32)
        return jnp.maximum(y + b_hid_ref[i], 0.0)

    if n_layers <= 4:
        # shallow: static unroll (full LLO scheduler visibility)
        for i in range(n_layers):
            h = layer(i, h)
    else:
        # deep: fori_loop bounds per-layer live ranges / code size
        h = jax.lax.fori_loop(0, n_layers, layer, h)

    # output block: (Dropout=id) + Linear(H -> 1) done as VPU mul + lane (XLU)
    # reduction instead of a 1-column MXU matmul, then Sigmoid with the exp on
    # the EUP and an approximate reciprocal (stays off the VPU divide path).
    logits = jnp.sum(h * w_out_ref[...], axis=-1, keepdims=True) + b_out_ref[0, 0]
    o_ref[...] = pl.reciprocal(1.0 + jnp.exp(-logits), approx=True).astype(o_ref.dtype)


def discrim_forward(x, params, *, batch_tile=None, compute_dtype=jnp.bfloat16):
    """x: [B, input_dim].  Returns [B, 1] float32 (eval-mode forward)."""
    w_in, b_in, w_hid, b_hid, w_out, b_out = params
    B, input_dim = x.shape
    hidden_dim = w_in.shape[1]
    n_layers = w_hid.shape[0]

    # MXU operands in bf16; epilogue parameters stay f32.
    x_c = x.astype(compute_dtype)
    w_in_c = w_in.astype(compute_dtype)
    w_hid_c = w_hid.astype(compute_dtype)
    b_in_f = b_in.astype(jnp.float32).reshape(1, hidden_dim)
    b_hid_f = b_hid.astype(jnp.float32).reshape(n_layers, 1, hidden_dim)
    w_out_row = w_out.astype(jnp.float32).reshape(1, hidden_dim)   # row vector for VPU reduce
    b_out_f = b_out.astype(jnp.float32).reshape(1, 1)

    # Explicit batch tile: 8-aligned, capped at 256 -> multi-step grid for
    # DMA/compute overlap and v7x dual-TC sharding of the "parallel" axis.
    if batch_tile is None:
        batch_tile = min(256, _round_up(B, 8))
    tb = _round_up(batch_tile, 8)
    Bp = _round_up(B, tb)
    if Bp != B:
        x_c = jnp.concatenate(
            [x_c, jnp.zeros((Bp - B, input_dim), x_c.dtype)], axis=0)

    kernel = functools.partial(_discrim_kernel, n_layers)

    # Explicit VMEM budget (default 2-deep buffering of every block) + headroom.
    op_bytes = jnp.dtype(compute_dtype).itemsize
    weight_bytes = (w_in_c.size * op_bytes + w_hid_c.size * op_bytes
                    + b_in_f.size * 4 + b_hid_f.size * 4 + w_out_row.size * 4)
    act_bytes = tb * input_dim * op_bytes + tb * 4            # x tile + out tile
    vmem_est = 2 * (weight_bytes + act_bytes) + 4 * tb * hidden_dim * 4 + (4 << 20)
    vmem_limit = int(min(max(vmem_est, 32 << 20), 64 << 20))

    cost = pl.CostEstimate(
        flops=2 * Bp * (input_dim * hidden_dim
                        + n_layers * hidden_dim * hidden_dim
                        + hidden_dim),
        transcendentals=Bp,
        bytes_accessed=int(Bp * input_dim * op_bytes + weight_bytes + Bp * 4),
    )

    grid_spec = pltpu.PrefetchScalarGridSpec(
        num_scalar_prefetch=0,
        grid=(Bp // tb,),
        in_specs=[
            pl.BlockSpec((tb, input_dim), lambda i: (i, 0)),                 # x tile (pipelined)
            pl.BlockSpec((input_dim, hidden_dim), lambda i: (0, 0)),         # w_in (resident)
            pl.BlockSpec((1, hidden_dim), lambda i: (0, 0)),                 # b_in
            pl.BlockSpec((n_layers, hidden_dim, hidden_dim),
                         lambda i: (0, 0, 0)),                               # w_hid stack
            pl.BlockSpec((n_layers, 1, hidden_dim), lambda i: (0, 0, 0)),    # b_hid stack
            pl.BlockSpec((1, hidden_dim), lambda i: (0, 0)),                 # w_out as row
            pl.BlockSpec(memory_space=pltpu.MemorySpace.SMEM),               # b_out scalar
        ],
        out_specs=pl.BlockSpec((tb, 1), lambda i: (i, 0)),
    )

    out = pl.pallas_call(
        kernel,
        out_shape=jax.ShapeDtypeStruct((Bp, 1), jnp.float32),
        grid_spec=grid_spec,
        compiler_params=pltpu.CompilerParams(
            dimension_semantics=("parallel",),
            vmem_limit_bytes=vmem_limit),
        cost_estimate=cost,
    )(x_c, w_in_c, b_in_f, w_hid_c, b_hid_f, w_out_row, b_out_f)

    return out[:B]


def init_params(key, input_dim, hidden_dim, n_layers):
    """Deterministic synthetic parameters (shapes match the nn.Linear layers,
    weights pre-transposed to [in, out] so y = x @ W + b)."""
    ks = jax.random.split(key, 6)
    scale_in = 1.0 / jnp.sqrt(input_dim)
    scale_h = 1.0 / jnp.sqrt(hidden_dim)
    w_in = jax.random.uniform(ks[0], (input_dim, hidden_dim),
                              minval=-scale_in, maxval=scale_in, dtype=jnp.float32)
    b_in = jax.random.uniform(ks[1], (1, hidden_dim),
                              minval=-scale_in, maxval=scale_in, dtype=jnp.float32)
    w_hid = jax.random.uniform(ks[2], (n_layers, hidden_dim, hidden_dim),
                               minval=-scale_h, maxval=scale_h, dtype=jnp.float32)
    b_hid = jax.random.uniform(ks[3], (n_layers, 1, hidden_dim),
                               minval=-scale_h, maxval=scale_h, dtype=jnp.float32)
    w_out = jax.random.uniform(ks[4], (hidden_dim, 1),
                               minval=-scale_h, maxval=scale_h, dtype=jnp.float32)
    b_out = jax.random.uniform(ks[5], (1, 1),
                               minval=-scale_h, maxval=scale_h, dtype=jnp.float32)
    return w_in, b_in, w_hid, b_hid, w_out, b_out


def discrim_ref_f32(x, params):
    """Pure-JAX f32 reference (eval-mode PyTorch semantics)."""
    w_in, b_in, w_hid, b_hid, w_out, b_out = params
    h = jnp.maximum(x @ w_in + b_in, 0.0)
    for i in range(w_hid.shape[0]):
        h = jnp.maximum(h @ w_hid[i] + b_hid[i], 0.0)
    return jax.nn.sigmoid(h @ w_out + b_out)


def discrim_ref_bf16(x, params):
    """Reference matching the kernel's operand precision (bf16 dots, f32 acc)."""
    w_in, b_in, w_hid, b_hid, w_out, b_out = params
    h = jnp.dot(x.astype(jnp.bfloat16), w_in.astype(jnp.bfloat16),
                preferred_element_type=jnp.float32)
    h = jnp.maximum(h + b_in, 0.0)
    for i in range(w_hid.shape[0]):
        h = jnp.dot(h.astype(jnp.bfloat16), w_hid[i].astype(jnp.bfloat16),
                    preferred_element_type=jnp.float32)
        h = jnp.maximum(h + b_hid[i], 0.0)
    return jax.nn.sigmoid(h @ w_out + b_out)


if __name__ == "__main__":
    key = jax.random.PRNGKey(0)
    k_x, k_p = jax.random.split(key)

    # Small config consistent with the module; batch=256 with tile=128 gives a
    # 2-step "parallel" grid (pipelined, and split across both TCs on v7x).
    batch, input_dim, hidden_dim, n_layers = 256, 16, 32, 2
    x = jax.random.normal(k_x, (batch, input_dim), dtype=jnp.float32)
    params = init_params(k_p, input_dim, hidden_dim, n_layers)

    out = discrim_forward(x, params, batch_tile=128)
    out = jax.block_until_ready(out)
    assert out.shape == (batch, 1)

    ref_bf = discrim_ref_bf16(x, params)   # same operand precision as kernel
    ref_f32 = discrim_ref_f32(x, params)   # original f32 PyTorch semantics
    assert jnp.allclose(out, ref_bf, atol=5e-3, rtol=5e-3), \
        float(jnp.max(jnp.abs(out - ref_bf)))
    assert jnp.allclose(out, ref_f32, atol=5e-2, rtol=0.0), \
        float(jnp.max(jnp.abs(out - ref_f32)))

    print("KERNEL_OK")
</pallas_src>

<mosaic_0001>
module attributes {stable_mosaic.version = 11 : i64} {
  func.func @_discrim_kernel(%arg0: i32, %arg1: memref<128x16xbf16, #tpu.memory_space<vmem>>, %arg2: memref<16x32xbf16, #tpu.memory_space<vmem>>, %arg3: memref<1x32xf32, #tpu.memory_space<vmem>>, %arg4: memref<2x32x32xbf16, #tpu.memory_space<vmem>>, %arg5: memref<2x1x32xf32, #tpu.memory_space<vmem>>, %arg6: memref<1x32xf32, #tpu.memory_space<vmem>>, %arg7: memref<1x1xf32, #tpu.memory_space<smem>>, %arg8: memref<128x1xf32, #tpu.memory_space<vmem>>) attributes {dimension_semantics = [#tpu.dimension_semantics<parallel>], iteration_bounds = array<i64: 2>, scalar_prefetch = 0 : i64, scratch_operands = 0 : i64, tpu.core_type = #tpu.core_type<tc>, window_params = [{transform_indices = @transform_0, window_bounds = array<i64: 128, 16>}, {pipeline_mode = #tpu.pipeline_mode<synchronous>, transform_indices = @transform_1, window_bounds = array<i64: 16, 32>}, {pipeline_mode = #tpu.pipeline_mode<synchronous>, transform_indices = @transform_2, window_bounds = array<i64: 1, 32>}, {pipeline_mode = #tpu.pipeline_mode<synchronous>, transform_indices = @transform_3, window_bounds = array<i64: 2, 32, 32>}, {pipeline_mode = #tpu.pipeline_mode<synchronous>, transform_indices = @transform_4, window_bounds = array<i64: 2, 1, 32>}, {pipeline_mode = #tpu.pipeline_mode<synchronous>, transform_indices = @transform_5, window_bounds = array<i64: 1, 32>}, {transform_indices = @transform_6, window_bounds = array<i64: 1, 1>}, {transform_indices = @transform_7, window_bounds = array<i64: 128, 1>}]} {
    %c0 = arith.constant 0 : index
    %c0_0 = arith.constant 0 : index
    %0 = vector.load %arg1[%c0, %c0_0] : memref<128x16xbf16, #tpu.memory_space<vmem>>, vector<128x16xbf16>
    %c0_1 = arith.constant 0 : index
    %c0_2 = arith.constant 0 : index
    %1 = vector.load %arg2[%c0_1, %c0_2] : memref<16x32xbf16, #tpu.memory_space<vmem>>, vector<16x32xbf16>
    %cst = arith.constant dense<0.000000e+00> : vector<128x32xf32>
    %2 = tpu.matmul %0, %1, %cst {dimension_numbers = #tpu.dot_dimension_numbers<[1], [0], [0], [1], [0, 0, 1, 1], [], []>} : vector<128x16xbf16>, vector<16x32xbf16>, vector<128x32xf32> -> vector<128x32xf32>
    %c0_3 = arith.constant 0 : index
    %c0_4 = arith.constant 0 : index
    %3 = vector.load %arg3[%c0_3, %c0_4] : memref<1x32xf32, #tpu.memory_space<vmem>>, vector<1x32xf32>
    %4 = vector.broadcast %3 : vector<1x32xf32> to vector<128x32xf32>
    %5 = arith.addf %2, %4 : vector<128x32xf32>
    %cst_5 = arith.constant 0.000000e+00 : f32
    %6 = vector.broadcast %cst_5 : f32 to vector<128x32xf32>
    %7 = arith.maximumf %5, %6 : vector<128x32xf32>
    %8 = arith.truncf %7 : vector<128x32xf32> to vector<128x32xbf16>
    %c0_6 = arith.constant 0 : index
    %c0_7 = arith.constant 0 : index
    %c0_8 = arith.constant 0 : index
    %9 = vector.load %arg4[%c0_6, %c0_7, %c0_8] : memref<2x32x32xbf16, #tpu.memory_space<vmem>>, vector<1x32x32xbf16>
    %10 = vector.shape_cast %9 : vector<1x32x32xbf16> to vector<32x32xbf16>
    %cst_9 = arith.constant dense<0.000000e+00> : vector<128x32xf32>
    %11 = tpu.matmul %8, %10, %cst_9 {dimension_numbers = #tpu.dot_dimension_numbers<[1], [0], [0], [1], [0, 0, 1, 1], [], []>} : vector<128x32xbf16>, vector<32x32xbf16>, vector<128x32xf32> -> vector<128x32xf32>
    %c0_10 = arith.constant 0 : index
    %c0_11 = arith.constant 0 : index
    %c0_12 = arith.constant 0 : index
    %12 = vector.load %arg5[%c0_10, %c0_11, %c0_12] : memref<2x1x32xf32, #tpu.memory_space<vmem>>, vector<1x1x32xf32>
    %13 = vector.shape_cast %12 : vector<1x1x32xf32> to vector<1x32xf32>
    %14 = vector.broadcast %13 : vector<1x32xf32> to vector<128x32xf32>
    %15 = arith.addf %11, %14 : vector<128x32xf32>
    %cst_13 = arith.constant 0.000000e+00 : f32
    %16 = vector.broadcast %cst_13 : f32 to vector<128x32xf32>
    %17 = arith.maximumf %15, %16 : vector<128x32xf32>
    %18 = arith.truncf %17 : vector<128x32xf32> to vector<128x32xbf16>
    %c1 = arith.constant 1 : index
    %c0_14 = arith.constant 0 : index
    %c0_15 = arith.constant 0 : index
    %19 = vector.load %arg4[%c1, %c0_14, %c0_15] : memref<2x32x32xbf16, #tpu.memory_space<vmem>>, vector<1x32x32xbf16>
    %20 = vector.shape_cast %19 : vector<1x32x32xbf16> to vector<32x32xbf16>
    %cst_16 = arith.constant dense<0.000000e+00> : vector<128x32xf32>
    %21 = tpu.matmul %18, %20, %cst_16 {dimension_numbers = #tpu.dot_dimension_numbers<[1], [0], [0], [1], [0, 0, 1, 1], [], []>} : vector<128x32xbf16>, vector<32x32xbf16>, vector<128x32xf32> -> vector<128x32xf32>
    %c1_17 = arith.constant 1 : index
    %c0_18 = arith.constant 0 : index
    %c0_19 = arith.constant 0 : index
    %22 = vector.load %arg5[%c1_17, %c0_18, %c0_19] : memref<2x1x32xf32, #tpu.memory_space<vmem>>, vector<1x1x32xf32>
    %23 = vector.shape_cast %22 : vector<1x1x32xf32> to vector<1x32xf32>
    %24 = vector.broadcast %23 : vector<1x32xf32> to vector<128x32xf32>
    %25 = arith.addf %21, %24 : vector<128x32xf32>
    %cst_20 = arith.constant 0.000000e+00 : f32
    %26 = vector.broadcast %cst_20 : f32 to vector<128x32xf32>
    %27 = arith.maximumf %25, %26 : vector<128x32xf32>
    %c0_21 = arith.constant 0 : index
    %c0_22 = arith.constant 0 : index
    %28 = vector.load %arg6[%c0_21, %c0_22] : memref<1x32xf32, #tpu.memory_space<vmem>>, vector<1x32xf32>
    %29 = vector.broadcast %28 : vector<1x32xf32> to vector<128x32xf32>
    %30 = arith.mulf %27, %29 : vector<128x32xf32>
    %cst_23 = arith.constant dense<0.000000e+00> : vector<128xf32>
    %31 = vector.multi_reduction <add>, %30, %cst_23 [1] : vector<128x32xf32> to vector<128xf32>
    %32 = vector.shape_cast %31 : vector<128xf32> to vector<128x1xf32>
    %c0_24 = arith.constant 0 : index
    %c0_25 = arith.constant 0 : index
    %33 = memref.load %arg7[%c0_24, %c0_25] : memref<1x1xf32, #tpu.memory_space<smem>>
    %34 = vector.broadcast %33 : f32 to vector<128x1xf32>
    %35 = arith.addf %32, %34 : vector<128x1xf32>
    %cst_26 = arith.constant 0.000000e+00 : f32
    %36 = vector.broadcast %cst_26 : f32 to vector<128x1xf32>
    %37 = arith.subf %36, %35 : vector<128x1xf32>
    %38 = math.exp %37 : vector<128x1xf32>
    %cst_27 = arith.constant 1.000000e+00 : f32
    %39 = vector.broadcast %cst_27 : f32 to vector<128x1xf32>
    %40 = arith.addf %39, %38 : vector<128x1xf32>
    %41 = tpu.reciprocal %40 {approx = true} : vector<128x1xf32> -> vector<128x1xf32>
    %c0_28 = arith.constant 0 : index
    %c0_29 = arith.constant 0 : index
    %42 = vector.load %arg8[%c0_28, %c0_29] : memref<128x1xf32, #tpu.memory_space<vmem>>, vector<128x1xf32>
    tpu.vector_store %arg8[%c0_28, %c0_29], %41 {strides = array<i32>} : memref<128x1xf32, #tpu.memory_space<vmem>>, vector<128x1xf32>,
    return
  }
  func.func @transform_0(%arg0: i32) -> (i32, i32) {
    %c0_i32 = arith.constant 0 : i32
    %c0_i32_0 = arith.constant 0 : i32
    return %arg0, %c0_i32 : i32, i32
  }
  func.func @transform_1(%arg0: i32) -> (i32, i32) {
    %c0_i32 = arith.constant 0 : i32
    %c0_i32_0 = arith.constant 0 : i32
    %c0_i32_1 = arith.constant 0 : i32
    return %c0_i32, %c0_i32_0 : i32, i32
  }
  func.func @transform_2(%arg0: i32) -> (i32, i32) {
    %c0_i32 = arith.constant 0 : i32
    %c0_i32_0 = arith.constant 0 : i32
    %c0_i32_1 = arith.constant 0 : i32
    return %c0_i32, %c0_i32_0 : i32, i32
  }
  func.func @transform_3(%arg0: i32) -> (i32, i32, i32) {
    %c0_i32 = arith.constant 0 : i32
    %c0_i32_0 = arith.constant 0 : i32
    %c0_i32_1 = arith.constant 0 : i32
    %c0_i32_2 = arith.constant 0 : i32
    return %c0_i32, %c0_i32_0, %c0_i32_1 : i32, i32, i32
  }
  func.func @transform_4(%arg0: i32) -> (i32, i32, i32) {
    %c0_i32 = arith.constant 0 : i32
    %c0_i32_0 = arith.constant 0 : i32
    %c0_i32_1 = arith.constant 0 : i32
    %c0_i32_2 = arith.constant 0 : i32
    return %c0_i32, %c0_i32_0, %c0_i32_1 : i32, i32, i32
  }
  func.func @transform_5(%arg0: i32) -> (i32, i32) {
    %c0_i32 = arith.constant 0 : i32
    %c0_i32_0 = arith.constant 0 : i32
    %c0_i32_1 = arith.constant 0 : i32
    return %c0_i32, %c0_i32_0 : i32, i32
  }
  func.func @transform_6(%arg0: i32) -> (i32, i32) {
    %c0_i32 = arith.constant 0 : i32
    %c0_i32_0 = arith.constant 0 : i32
    %c0_i32_1 = arith.constant 0 : i32
    return %c0_i32, %c0_i32_0 : i32, i32
  }
  func.func @transform_7(%arg0: i32) -> (i32, i32) {
    %c0_i32 = arith.constant 0 : i32
    %c0_i32_0 = arith.constant 0 : i32
    return %arg0, %c0_i32 : i32, i32
  }
}

</mosaic_0001>

<bundles_post_ra>
// kernel: tpu_custom_call.1
= control target key start
LH: loop header
LB: loop body
LE: loop exit
PB: predicated region body
PF: predicated region fallthrough
CT: control target
= control target key end

     0   :  { %s1356_s26 = smov 0   ;;  %s1532_s0 = inlined_call_operand.vmem [shape: bf16[256,16], index: 0, kind: input, shape index: {}]   ;;  %s1533_s1 = inlined_call_operand.vmem [shape: bf16[16,32], index: 1, kind: input, shape index: {}]   ;;  %s1534_s2 = inlined_call_operand.vmem [shape: f32[1,32], index: 2, kind: input, shape index: {}]   ;;  %s1535_s3 = inlined_call_operand.vmem [shape: bf16[2,32,32], index: 3, kind: input, shape index: {}]   ;;  %s1536_s4 = inlined_call_operand.vmem [shape: f32[2,1,32], index: 4, kind: input, shape index: {}]   ;;  %s1537_s5 = inlined_call_operand.vmem [shape: f32[1,32], index: 5, kind: input, shape index: {}]   ;;  %s1538_s6 = inlined_call_operand.<no memory space> [shape: f32[1,1], index: 6, kind: input, shape index: {}]   ;;  %s1539_s7 = inlined_call_operand.vmem [shape: f32[256,1], index: 7, kind: output, shape index: {}]  }
   0x1   :  { %12 = sst [smem:[#allocation2]] %s1538_s6 }
   0x2 LB: > { %s1074_s27 = sadd.s32 4294967295, %s1311_s26   ;;  %p1078_p0 = scmp.ge.s32.totalorder %s1311_s26, 1  ;;  %s1311_s26 = sphi %s1356_s26, %s18_s26  }
   0x3   : > { %p239_p1 = scmp.lt.s32.totalorder %s1311_s26, 3 }
   0x5   : > { %p240_p2 = pnand %p1078_p0, %p239_p1 }
   0x6   : > { %v1228_v0 = vld [vmem:[%s1533_s1] sm:$0xff] (!%p240_p2)   ;;  %s1079_s6 = sshll.u32 (!%p240_p2), %s1074_s27, 4  ;;  %vm355_vm0 = vcmask (!%p240_p2), 130048   ;;  %v1238_v10 = vld [vmem:[%s1535_s3 + $0x8] sm:$0xff] (!%p240_p2)   ;;  %v1239_v11 = vld [vmem:[%s1535_s3 + $0x10] sm:$0xff] (!%p240_p2)   ;;  %vm524_vm1 = vcmask (!%p240_p2), 261120  }
   0x7   : > { %243 = sbr.rel (%p240_p2) target bundleno = 886 (0x376), region = 48  ;;  %p272_p3 = scmp.lt.s32.totalorder (!%p240_p2), %s1079_s6, 31  ;;  %1160 = vmatprep.subr.bf16.mxu0 (!%p240_p2), %v1228_v0  ;;  %1218 = vmatprep.subr.bf16.mxu1 (!%p240_p2), %v1228_v0  ;;  %v1237_v1 = vld [vmem:[%s1535_s3] sm:$0xff] (!%p240_p2)   ;;  %vm1001_vm2 = vcmask (!%p240_p2), 7168  }
   0x8   : > { %1161 = vmatpush3.bf16.msra.mxu0 (!%p240_p2), %v1228_v0  ;;  %1219 = vmatpush3.bf16.msra.mxu1 (!%p240_p2), %v1228_v0  ;;  %v1083_v12 = vld [vmem:[%s1534_s2] ss:$0 sm:$0xff] (!%p240_p2)  ;;  %s903_s28 = sld [smem:[#allocation2]] (!%p240_p2) }
   0x9   : > { %1178 = vmatprep.subr.bf16.mxu1 (!%p240_p2), %v1237_v1  ;;  %1198 = vmatprep.subr.bf16.mxu0 (!%p240_p2), %v1239_v11 }
   0xe   : > { %s1541_s6 = smov (!%p272_p3, %s1079_s6), 31 }
   0xf   : > { %s1080_s9 = sshll.u32 %s1541_s6, 2  ;;  %s1082_s29 = sshll.u32 %s1541_s6, 3 }
  0x10   : > { %s275_s12 = scalar_lea.vmem %s1532_s0, %s1080_s9  ;;  %s1492_s9 = scalar_lea.vmem %s1539_s7, %s1082_s29 }
  0x11   : > { %v1229_v2 = vld [vmem:[%s275_s12] sm:$0xff]   ;;  %v1230_v3 = vld [vmem:[%s275_s12 + $0x8] sm:$0xff]   ;;  %v1231_v4 = vld [vmem:[%s275_s12 + $0x10] sm:$0xff]  }
  0x12   : > { %1162 = vmatprep.mubr.msk.bf16.mxu0 %vm355_vm0, %v1229_v2  ;;  %v1233_v5 = vld [vmem:[%s275_s12 + $0x20] sm:$0xff]   ;;  %v1234_v6 = vld [vmem:[%s275_s12 + $0x28] sm:$0xff]   ;;  %v1235_v7 = vld [vmem:[%s275_s12 + $0x30] sm:$0xff]  }
  0x13   : > { %1163 = vmatmul.mubr.msk.bf16.vlgmr.msra.gmra.mrb[0].mxu0 %vm355_vm0, %v1230_v3  ;;  %1170 = vmatprep.mubr.msk.bf16.mxu1 %vm355_vm0, %v1233_v5  ;;  %v1232_v8 = vld [vmem:[%s275_s12 + $0x18] sm:$0xff]  }
  0x14   : > { %1166 = vmatprep.mubr.msk.bf16.mxu0 %vm355_vm0, %v1231_v4  ;;  %1171 = vmatmul.mubr.msk.bf16.vlgmr.msra.gmra.mrb[0].mxu1 %vm355_vm0, %v1234_v6  ;;  %v1236_v9 = vld [vmem:[%s275_s12 + $0x38] sm:$0xff]   ;;  %v1101_v6 = vld [vmem:[%s1536_s4] ss:$0 sm:$0xff] }
  0x15   : > { %1174 = vmatprep.mubr.msk.bf16.mxu1 %vm355_vm0, %v1235_v7  ;;  %1179 = vmatpush3.bf16.msra.mxu1 %v1237_v1  ;;  %v1240_v5 = vld [vmem:[%s1535_s3 + $0x18] sm:$0xff]  }
  0x16   : > { %1180 = vmatprep.subr.bf16.mxu1 %v1238_v10  ;;  %1199 = vmatpush3.bf16.msra.mxu0 %v1239_v11 }
  0x17   : > { %1200 = vmatprep.subr.bf16.mxu0 %v1240_v5 }
  0x19   : > { %1181 = vmatpush3.bf16.msra.mxu1 %v1238_v10 }
  0x1a   : > { %1201 = vmatpush3.bf16.msra.mxu0 %v1240_v5  ;;  %v1425_v5 = vld [vmem:[%s1537_s5] ss:$0 sm:$0xff] }
  0x1b   : > { %1167 = vmatmul.mubr.msk.bf16.gmra.mrb[4].mxu0 %vm355_vm0, %v1232_v8 }
  0x1c   : > { %1175 = vmatmul.mubr.msk.bf16.gmra.mrb[4].mxu1 %vm355_vm0, %v1236_v9 }
  0xe6   : > { %v1164_v13 = vpop.f32.mrb[0].mxu0 }
  0xe7   : > { %v423_v14 = vadd.f32 %v1164_v13, %v1083_v12  ;;  %v414_v15 = vpop.f32.mrb[1].mxu0  ;;  %v1172_v21 = vpop.f32.mrb[0].mxu1 }
  0xe8   : > { %v415_v16 = vadd.f32 %v1083_v12, %v414_v15  ;;  %v1165_v17 = vpop.f32.mrb[2].mxu0  ;;  %v455_v24 = vadd.f32 %v1172_v21, %v1083_v12  ;;  %v446_v25 = vpop.f32.mrb[1].mxu1 }
  0xe9   : > { %v426_v18 = vadd.f32 %v1165_v17, %v1083_v12  ;;  %v417_v19 = vpop.f32.mrb[3].mxu0  ;;  %v479_v22 = vmax.f32 %v423_v14, 0.0  ;;  %v447_v28 = vadd.f32 %v1083_v12, %v446_v25  ;;  %v1173_v29 = vpop.f32.mrb[2].mxu1 }
  0xea   : > { %v418_v20 = vadd.f32 %v1083_v12, %v417_v19  ;;  %v477_v26 = vmax.f32 %v415_v16, 0.0  ;;  %v487_v31 = vmax.f32 %v455_v24, 0.0  ;;  %v458_v32 = vadd.f32 %v1173_v29, %v1083_v12  ;;  %v449_v33 = vpop.f32.mrb[3].mxu1 }
  0xeb   : > { %v480_v23 = vmax.f32 %v426_v18, 0.0  ;;  %v485_v36 = vmax.f32 %v447_v28, 0.0  ;;  %v450_v37 = vadd.f32 %v1083_v12, %v449_v33 }
  0xec   : > { %v478_v27 = vmax.f32 %v418_v20, 0.0  ;;  %v488_v40 = vmax.f32 %v458_v32, 0.0 }
  0xed   : > { %v494_v30 = vpack.c.bf16 %v480_v23, %v479_v22  ;;  %v486_v43 = vmax.f32 %v450_v37, 0.0 }
  0xee   : > { %v493_v34 = vpack.c.bf16 %v478_v27, %v477_v26  ;;  %v1168_v35 = vpop.f32.mrb[4].mxu0  ;;  %v498_v46 = vpack.c.bf16 %v488_v40, %v487_v31 }
  0xef   : > { %v439_v38 = vadd.f32 %v1168_v35, %v1083_v12  ;;  %v430_v39 = vpop.f32.mrb[5].mxu0  ;;  %v497_v48 = vpack.c.bf16 %v486_v43, %v485_v36  ;;  %v1176_v49 = vpop.f32.mrb[4].mxu1 }
  0xf0   : > { %v431_v41 = vadd.f32 %v1083_v12, %v430_v39  ;;  %v1169_v42 = vpop.f32.mrb[6].mxu0  ;;  %1182 = vmatprep.mubr.msk.bf16.mxu1 %vm524_vm1, %v493_v34  ;;  %v471_v52 = vadd.f32 %v1176_v49, %v1083_v12  ;;  %v462_v53 = vpop.f32.mrb[5].mxu1 }
  0xf1   : > { %v442_v44 = vadd.f32 %v1169_v42, %v1083_v12  ;;  %v433_v45 = vpop.f32.mrb[7].mxu0  ;;  %1183 = vmatmul.mubr.msk.bf16.vlgmr.msra.gmra.mrb[8].mxu1 %vm524_vm1, %v494_v30  ;;  %v483_v50 = vmax.f32 %v439_v38, 0.0  ;;  %v463_v56 = vadd.f32 %v1083_v12, %v462_v53  ;;  %v1177_v57 = vpop.f32.mrb[6].mxu1 }
  0xf2   : > { %v434_v47 = vadd.f32 %v1083_v12, %v433_v45  ;;  %v481_v54 = vmax.f32 %v431_v41, 0.0  ;;  %v491_v59 = vmax.f32 %v471_v52, 0.0  ;;  %v474_v60 = vadd.f32 %v1177_v57, %v1083_v12  ;;  %v465_v61 = vpop.f32.mrb[7].mxu1 }
  0xf3   : > { %v484_v51 = vmax.f32 %v442_v44, 0.0  ;;  %v489_v63 = vmax.f32 %v463_v56, 0.0  ;;  %v466_v0 = vadd.f32 %v1083_v12, %v465_v61 }
  0xf4   : > { %v482_v55 = vmax.f32 %v434_v47, 0.0  ;;  %v492_v1 = vmax.f32 %v474_v60, 0.0 }
  0xf5   : > { %v496_v58 = vpack.c.bf16 %v484_v51, %v483_v50  ;;  %v490_v2 = vmax.f32 %v466_v0, 0.0 }
  0xf6   : > { %v495_v62 = vpack.c.bf16 %v482_v55, %v481_v54  ;;  %v500_v3 = vpack.c.bf16 %v492_v1, %v491_v59 }
  0xf7   : > { %v499_v4 = vpack.c.bf16 %v490_v2, %v489_v63  ;;  %v1418_v63 = vld [vmem:[%s1536_s4 + $0x1] ss:$0 sm:$0xff] }
  0xf8   : > { %1186 = vmatprep.mubr.msk.bf16.mxu1 %vm524_vm1, %v495_v62 }
  0xf9   : > { %1187 = vmatmul.mubr.msk.bf16.gmra.mrb[12].mxu1 %vm524_vm1, %v496_v58 }
  0xfa   : > { %1190 = vmatprep.mubr.msk.bf16.mxu1 %vm524_vm1, %v497_v48 }
 0x101   : > { %1191 = vmatmul.mubr.msk.bf16.gmra.mrb[16].mxu1 %vm524_vm1, %v498_v46 }
 0x102   : > { %1194 = vmatprep.mubr.msk.bf16.mxu1 %vm524_vm1, %v499_v4 }
 0x109   : > { %1195 = vmatmul.mubr.msk.bf16.gmra.mrb[20].mxu1 %vm524_vm1, %v500_v3 }
 0x1c4   : > { %v1184_v7 = vpop.f32.mrb[8].mxu1 }
 0x1c5   : > { %v592_v8 = vadd.f32 %v1184_v7, %v1101_v6  ;;  %v583_v9 = vpop.f32.mrb[9].mxu1 }
 0x1c6   : > { %v584_v10 = vadd.f32 %v1101_v6, %v583_v9  ;;  %v1185_v11 = vpop.f32.mrb[10].mxu1 }
 0x1c7   : > { %v595_v12 = vadd.f32 %v1185_v11, %v1101_v6  ;;  %v586_v13 = vpop.f32.mrb[11].mxu1  ;;  %v648_v15 = vmax.f32 %v592_v8, 0.0 }
 0x1c8   : > { %v587_v14 = vadd.f32 %v1101_v6, %v586_v13  ;;  %v646_v17 = vmax.f32 %v584_v10, 0.0 }
 0x1c9   : > { %v649_v16 = vmax.f32 %v595_v12, 0.0 }
 0x1ca   : > { %v647_v18 = vmax.f32 %v587_v14, 0.0 }
 0x1cb   : > { %v663_v19 = vpack.c.bf16 %v649_v16, %v648_v15 }
 0x1cc   : > { %v662_v20 = vpack.c.bf16 %v647_v18, %v646_v17  ;;  %v1188_v21 = vpop.f32.mrb[12].mxu1 }
 0x1cd   : > { %v608_v22 = vadd.f32 %v1188_v21, %v1101_v6  ;;  %v599_v23 = vpop.f32.mrb[13].mxu1 }
 0x1ce   : > { %v600_v24 = vadd.f32 %v1101_v6, %v599_v23  ;;  %v1189_v25 = vpop.f32.mrb[14].mxu1  ;;  %1202 = vmatprep.mubr.msk.bf16.mxu0 %vm524_vm1, %v662_v20 }
 0x1cf   : > { %v611_v26 = vadd.f32 %v1189_v25, %v1101_v6  ;;  %v602_v27 = vpop.f32.mrb[15].mxu1  ;;  %1203 = vmatmul.mubr.msk.bf16.vlgmr.msra.gmra.mrb[8].mxu0 %vm524_vm1, %v663_v19  ;;  %v652_v29 = vmax.f32 %v608_v22, 0.0 }
 0x1d0   : > { %v603_v28 = vadd.f32 %v1101_v6, %v602_v27  ;;  %v650_v31 = vmax.f32 %v600_v24, 0.0 }
 0x1d1   : > { %v653_v30 = vmax.f32 %v611_v26, 0.0 }
 0x1d2   : > { %v651_v32 = vmax.f32 %v603_v28, 0.0 }
 0x1d3   : > { %v665_v33 = vpack.c.bf16 %v653_v30, %v652_v29 }
 0x1d4   : > { %v664_v34 = vpack.c.bf16 %v651_v32, %v650_v31  ;;  %v1192_v35 = vpop.f32.mrb[16].mxu1 }
 0x1d5   : > { %v624_v36 = vadd.f32 %v1192_v35, %v1101_v6  ;;  %v615_v37 = vpop.f32.mrb[17].mxu1 }
 0x1d6   : > { %v616_v38 = vadd.f32 %v1101_v6, %v615_v37  ;;  %v1193_v39 = vpop.f32.mrb[18].mxu1  ;;  %1206 = vmatprep.mubr.msk.bf16.mxu0 %vm524_vm1, %v664_v34 }
 0x1d7   : > { %v627_v40 = vadd.f32 %v1193_v39, %v1101_v6  ;;  %v618_v41 = vpop.f32.mrb[19].mxu1  ;;  %1207 = vmatmul.mubr.msk.bf16.gmra.mrb[12].mxu0 %vm524_vm1, %v665_v33  ;;  %v656_v43 = vmax.f32 %v624_v36, 0.0 }
 0x1d8   : > { %v619_v42 = vadd.f32 %v1101_v6, %v618_v41  ;;  %v654_v45 = vmax.f32 %v616_v38, 0.0 }
 0x1d9   : > { %v657_v44 = vmax.f32 %v627_v40, 0.0 }
 0x1da   : > { %v655_v46 = vmax.f32 %v619_v42, 0.0 }
 0x1db   : > { %v667_v47 = vpack.c.bf16 %v657_v44, %v656_v43 }
 0x1dc   : > { %v666_v48 = vpack.c.bf16 %v655_v46, %v654_v45  ;;  %v1196_v49 = vpop.f32.mrb[20].mxu1 }
 0x1dd   : > { %v640_v50 = vadd.f32 %v1196_v49, %v1101_v6  ;;  %v631_v51 = vpop.f32.mrb[21].mxu1 }
 0x1de   : > { %v632_v52 = vadd.f32 %v1101_v6, %v631_v51  ;;  %v1197_v53 = vpop.f32.mrb[22].mxu1  ;;  %1210 = vmatprep.mubr.msk.bf16.mxu0 %vm524_vm1, %v666_v48 }
 0x1df   : > { %v643_v54 = vadd.f32 %v1197_v53, %v1101_v6  ;;  %v634_v55 = vpop.f32.mrb[23].mxu1  ;;  %1211 = vmatmul.mubr.msk.bf16.gmra.mrb[16].mxu0 %vm524_vm1, %v667_v47  ;;  %v660_v57 = vmax.f32 %v640_v50, 0.0 }
 0x1e0   : > { %v635_v56 = vadd.f32 %v1101_v6, %v634_v55  ;;  %v658_v59 = vmax.f32 %v632_v52, 0.0 }
 0x1e1   : > { %v661_v58 = vmax.f32 %v643_v54, 0.0 }
 0x1e2   : > { %v659_v60 = vmax.f32 %v635_v56, 0.0 }
 0x1e3   : > { %v669_v61 = vpack.c.bf16 %v661_v58, %v660_v57 }
 0x1e4   : > { %v668_v62 = vpack.c.bf16 %v659_v60, %v658_v59 }
 0x1e6   : > { %1214 = vmatprep.mubr.msk.bf16.mxu0 %vm524_vm1, %v668_v62 }
 0x1e7   : > { %1215 = vmatmul.mubr.msk.bf16.gmra.mrb[20].mxu0 %vm524_vm1, %v669_v61 }
 0x2a2   : > { %v1204_v0 = vpop.f32.mrb[8].mxu0 }
 0x2a3   : > { %v762_v1 = vadd.f32 %v1204_v0, %v1418_v63  ;;  %v753_v2 = vpop.f32.mrb[9].mxu0 }
 0x2a4   : > { %v754_v3 = vadd.f32 %v1418_v63, %v753_v2  ;;  %v1205_v4 = vpop.f32.mrb[10].mxu0 }
 0x2a5   : > { %v818_v6 = vmax.f32 %v762_v1, 0.0  ;;  %v765_v7 = vadd.f32 %v1205_v4, %v1418_v63  ;;  %v756_v8 = vpop.f32.mrb[11].mxu0 }
 0x2a6   : > { %v816_v9 = vmax.f32 %v754_v3, 0.0  ;;  %v757_v10 = vadd.f32 %v1418_v63, %v756_v8 }
 0x2a7   : > { %v819_v11 = vmax.f32 %v765_v7, 0.0  ;;  %v841_v12 = vmul.f32 %v1425_v5, %v818_v6 }
 0x2a8   : > { %v817_v13 = vmax.f32 %v757_v10, 0.0  ;;  %v839_v14 = vmul.f32 %v1425_v5, %v816_v9 }
 0x2a9   : > { %v861_v15 = vsel %vm524_vm1, %v841_v12, 0.0  ;;  %v842_v16 = vmul.f32 %v1425_v5, %v819_v11 }
 0x2aa   : > { %862 = vadd.xlane.f32.xlu1 %v861_v15  ;;  %v1208_v17 = vpop.f32.mrb[12].mxu0  ;;  %v855_v18 = vsel %vm524_vm1, %v839_v14, 0.0  ;;  %v840_v19 = vmul.f32 %v1425_v5, %v817_v13 }
 0x2ab   : > { %v778_v20 = vadd.f32 %v1208_v17, %v1418_v63  ;;  %v769_v21 = vpop.f32.mrb[13].mxu0  ;;  %856 = vadd.xlane.f32.xlu0 %v855_v18  ;;  %v864_v27 = vsel %vm524_vm1, %v842_v16, 0.0  ;;  %v1473_v18 = vstv %s903_s28 }
 0x2ac   : > { %v770_v22 = vadd.f32 %v1418_v63, %v769_v21  ;;  %v1209_v23 = vpop.f32.mrb[14].mxu0  ;;  %v858_v30 = vsel %vm524_vm1, %v840_v19, 0.0 }
 0x2ad   : > { %v822_v24 = vmax.f32 %v778_v20, 0.0  ;;  %v781_v25 = vadd.f32 %v1209_v23, %v1418_v63  ;;  %v772_v26 = vpop.f32.mrb[15].mxu0 }
 0x2ae   : > { %v820_v28 = vmax.f32 %v770_v22, 0.0  ;;  %v773_v29 = vadd.f32 %v1418_v63, %v772_v26  ;;  %865 = vadd.xlane.f32.xlu1 %v864_v27 }
 0x2af   : > { %v823_v31 = vmax.f32 %v781_v25, 0.0  ;;  %859 = vadd.xlane.f32.xlu0 %v858_v30  ;;  %v845_v32 = vmul.f32 %v1425_v5, %v822_v24 }
 0x2b0   : > { %v821_v33 = vmax.f32 %v773_v29, 0.0  ;;  %v843_v37 = vmul.f32 %v1425_v5, %v820_v28 }
 0x2b1   : > { %v873_v34 = vsel %vm524_vm1, %v845_v32, 0.0  ;;  %v846_v35 = vmul.f32 %v1425_v5, %v823_v31 }
 0x2b2   : > { %v1212_v36 = vpop.f32.mrb[16].mxu0  ;;  %v844_v41 = vmul.f32 %v1425_v5, %v821_v33  ;;  %v867_v49 = vsel %vm524_vm1, %v843_v37, 0.0 }
 0x2b3   : > { %v794_v38 = vadd.f32 %v1212_v36, %v1418_v63  ;;  %v785_v39 = vpop.f32.mrb[17].mxu0  ;;  %874 = vadd.xlane.f32.xlu0 %v873_v34  ;;  %v876_v40 = vsel %vm524_vm1, %v846_v35, 0.0 }
 0x2b4   : > { %v786_v42 = vadd.f32 %v1418_v63, %v785_v39  ;;  %877 = vadd.xlane.f32.xlu1 %v876_v40  ;;  %v1213_v43 = vpop.f32.mrb[18].mxu0  ;;  %v870_v51 = vsel %vm524_vm1, %v844_v41, 0.0 }
 0x2b5   : > { %v826_v44 = vmax.f32 %v794_v38, 0.0  ;;  %v797_v45 = vadd.f32 %v1213_v43, %v1418_v63  ;;  %v788_v46 = vpop.f32.mrb[19].mxu0 }
 0x2b6   : > { %v824_v47 = vmax.f32 %v786_v42, 0.0  ;;  %v789_v48 = vadd.f32 %v1418_v63, %v788_v46 }
 0x2b7   : > { %v827_v50 = vmax.f32 %v797_v45, 0.0  ;;  %868 = vadd.xlane.f32.xlu0 %v867_v49  ;;  %v849_v52 = vmul.f32 %v1425_v5, %v826_v44 }
 0x2b8   : > { %v825_v53 = vmax.f32 %v789_v48, 0.0  ;;  %871 = vadd.xlane.f32.xlu1 %v870_v51  ;;  %v847_v57 = vmul.f32 %v1425_v5, %v824_v47 }
 0x2b9   : > { %v885_v54 = vsel %vm524_vm1, %v849_v52, 0.0  ;;  %v850_v55 = vmul.f32 %v1425_v5, %v827_v50 }
 0x2ba   : > { %v1216_v56 = vpop.f32.mrb[20].mxu0  ;;  %v848_v61 = vmul.f32 %v1425_v5, %v825_v53  ;;  %v879_v7 = vsel %vm524_vm1, %v847_v57, 0.0 }
 0x2bb   : > { %v810_v58 = vadd.f32 %v1216_v56, %v1418_v63  ;;  %v801_v59 = vpop.f32.mrb[21].mxu0  ;;  %886 = vadd.xlane.f32.xlu0 %v885_v54  ;;  %v888_v60 = vsel %vm524_vm1, %v850_v55, 0.0 }
 0x2bc   : > { %v802_v62 = vadd.f32 %v1418_v63, %v801_v59  ;;  %v1217_v0 = vpop.f32.mrb[22].mxu0  ;;  %889 = vadd.xlane.f32.xlu1 %v888_v60  ;;  %v882_v8 = vsel %vm524_vm1, %v848_v61, 0.0 }
 0x2bd   : > { %v813_v1 = vadd.f32 %v1217_v0, %v1418_v63  ;;  %v804_v2 = vpop.f32.mrb[23].mxu0  ;;  %v830_v3 = vmax.f32 %v810_v58, 0.0 }
 0x2be   : > { %v828_v4 = vmax.f32 %v802_v62, 0.0  ;;  %v805_v6 = vadd.f32 %v1418_v63, %v804_v2 }
 0x2bf   : > { %880 = vadd.xlane.f32.xlu0 %v879_v7  ;;  %v831_v9 = vmax.f32 %v813_v1, 0.0  ;;  %v853_v14 = vmul.f32 %v1425_v5, %v830_v3 }
 0x2c0   : > { %v829_v10 = vmax.f32 %v805_v6, 0.0  ;;  %883 = vadd.xlane.f32.xlu1 %v882_v8  ;;  %v851_v11 = vmul.f32 %v1425_v5, %v828_v4 }
 0x2c1   : > { %v854_v63 = vmul.f32 %v1425_v5, %v831_v9  ;;  %v897_v16 = vsel %vm524_vm1, %v853_v14, 0.0 }
 0x2c2   : > { %v891_v12 = vsel %vm524_vm1, %v851_v11, 0.0  ;;  %v852_v13 = vmul.f32 %v1425_v5, %v829_v10 }
 0x2c3   : > { %892 = vadd.xlane.f32.xlu0 %v891_v12  ;;  %v900_v17 = vsel %vm524_vm1, %v854_v63, 0.0 }
 0x2c4   : > { %v894_v15 = vsel %vm524_vm1, %v852_v13, 0.0 }
 0x2c5   : > { %895 = vadd.xlane.f32.xlu1 %v894_v15 }
 0x2c7   : > { %898 = vadd.xlane.f32.xlu0 %v897_v16 }
 0x2c9   : > { %901 = vadd.xlane.f32.xlu1 %v900_v17 }
 0x337   : > { %v863_v19 = vpop.xlane.xlu1 %862 }
 0x338   : > { %v907_v20 = vadd.f32 %v1473_v18, %v863_v19  ;;  %v857_v21 = vpop.xlane.xlu0 %856 }
 0x339   : > { %v905_v22 = vadd.f32 %v1473_v18, %v857_v21 }
 0x33a   : > { %v923_v23 = vsub.f32 0.0, %v907_v20 }
 0x33b   : > { %v921_v24 = vsub.f32 0.0, %v905_v22  ;;  %v866_v25 = vpop.xlane.xlu1 %865 }
 0x33c   : > { %v941_v5 = vmul.f32 1.442695, %v923_v23  ;;  %v908_v26 = vadd.f32 %v1473_v18, %v866_v25  ;;  %v860_v27 = vpop.xlane.xlu0 %859 }
 0x33d   : > { %v937_v28 = vmul.f32 1.442695, %v921_v24  ;;  %v906_v29 = vadd.f32 %v1473_v18, %v860_v27 }
 0x33e   : > { %1241 = vpow2.f32 %v941_v5  ;;  %v924_v30 = vsub.f32 0.0, %v908_v26 }
 0x33f   : > { %1243 = vpow2.f32 %v937_v28  ;;  %v922_v31 = vsub.f32 0.0, %v906_v29 }
 0x340   : > { %v943_v32 = vmul.f32 1.442695, %v924_v30  ;;  %v875_v33 = vpop.xlane.xlu0 %874 }
 0x341   : > { %v939_v34 = vmul.f32 1.442695, %v922_v31  ;;  %v911_v35 = vadd.f32 %v1473_v18, %v875_v33  ;;  %v878_v36 = vpop.xlane.xlu1 %877 }
 0x342   : > { %1245 = vpow2.f32 %v943_v32  ;;  %v912_v37 = vadd.f32 %v1473_v18, %v878_v36 }
 0x343   : > { %1247 = vpow2.f32 %v939_v34  ;;  %v927_v38 = vsub.f32 0.0, %v911_v35 }
 0x344   : > { %v928_v39 = vsub.f32 0.0, %v912_v37  ;;  %v869_v40 = vpop.xlane.xlu0 %868 }
 0x345   : > { %v949_v41 = vmul.f32 1.442695, %v927_v38  ;;  %v909_v42 = vadd.f32 %v1473_v18, %v869_v40  ;;  %v872_v43 = vpop.xlane.xlu1 %871 }
 0x346   : > { %v951_v44 = vmul.f32 1.442695, %v928_v39  ;;  %v910_v45 = vadd.f32 %v1473_v18, %v872_v43 }
 0x347   : > { %1249 = vpow2.f32 %v949_v41  ;;  %v925_v46 = vsub.f32 0.0, %v909_v42 }
 0x348   : > { %v1242_v47 = vpop.eup %1241  ;;  %1251 = vpow2.f32 %v951_v44  ;;  %v926_v48 = vsub.f32 0.0, %v910_v45  ;;  %v887_v49 = vpop.xlane.xlu0 %886 }
 0x349   : > { %v1244_v50 = vpop.eup %1243  ;;  %v971_v51 = vadd.f32 1.0, %v1242_v47  ;;  %v945_v52 = vmul.f32 1.442695, %v925_v46  ;;  %v915_v53 = vadd.f32 %v1473_v18, %v887_v49  ;;  %v890_v54 = vpop.xlane.xlu1 %889 }
 0x34a   : > { %v969_v55 = vadd.f32 1.0, %v1244_v50  ;;  %v947_v56 = vmul.f32 1.442695, %v926_v48  ;;  %v916_v57 = vadd.f32 %v1473_v18, %v890_v54 }
 0x34b   : > { %1253 = vrcp.f32 %v971_v51  ;;  %v931_v58 = vsub.f32 0.0, %v915_v53 }
 0x34c   : > { %v1246_v59 = vpop.eup %1245  ;;  %1255 = vrcp.f32 %v969_v55  ;;  %v932_v60 = vsub.f32 0.0, %v916_v57  ;;  %v881_v61 = vpop.xlane.xlu0 %880 }
 0x34d   : > { %v1248_v62 = vpop.eup %1247  ;;  %v972_v0 = vadd.f32 1.0, %v1246_v59  ;;  %1257 = vpow2.f32 %v945_v52  ;;  %v957_v1 = vmul.f32 1.442695, %v931_v58  ;;  %v913_v2 = vadd.f32 %v1473_v18, %v881_v61  ;;  %v884_v3 = vpop.xlane.xlu1 %883 }
 0x34e   : > { %v970_v4 = vadd.f32 1.0, %v1248_v62  ;;  %1259 = vpow2.f32 %v947_v56  ;;  %v959_v6 = vmul.f32 1.442695, %v932_v60  ;;  %v914_v7 = vadd.f32 %v1473_v18, %v884_v3 }
 0x34f   : > { %1261 = vrcp.f32 %v972_v0  ;;  %v929_v8 = vsub.f32 0.0, %v913_v2 }
 0x350   : > { %1263 = vrcp.f32 %v970_v4  ;;  %v930_v9 = vsub.f32 0.0, %v914_v7  ;;  %v893_v10 = vpop.xlane.xlu0 %892 }
 0x351   : > { %v1250_v11 = vpop.eup %1249  ;;  %1265 = vpow2.f32 %v957_v1  ;;  %v953_v12 = vmul.f32 1.442695, %v929_v8  ;;  %v917_v13 = vadd.f32 %v1473_v18, %v893_v10 }
 0x352   : > { %v1252_v14 = vpop.eup %1251  ;;  %v975_v15 = vadd.f32 1.0, %v1250_v11  ;;  %1267 = vpow2.f32 %v959_v6  ;;  %v955_v63 = vmul.f32 1.442695, %v930_v9  ;;  %v896_v16 = vpop.xlane.xlu1 %895 }
 0x353   : > { %v976_v17 = vadd.f32 1.0, %v1252_v14  ;;  %1269 = vpow2.f32 %v953_v12  ;;  %v933_v19 = vsub.f32 0.0, %v917_v13  ;;  %v918_v20 = vadd.f32 %v1473_v18, %v896_v16 }
 0x354   : > { %1271 = vrcp.f32 %v975_v15  ;;  %v899_v21 = vpop.xlane.xlu0 %898 }
 0x355   : > { %v1254_v22 = vpop.eup %1253  ;;  %1273 = vrcp.f32 %v976_v17  ;;  %v961_v23 = vmul.f32 1.442695, %v933_v19  ;;  %v934_v24 = vsub.f32 0.0, %v918_v20  ;;  %v919_v25 = vadd.f32 %v1473_v18, %v899_v21 }
 0x356   : > { %v1256_v5 = vpop.eup %1255  ;;  %1004 = vst.msk [vmem:[%s1492_s9 + $0x10] sm:$0xff] %vm1001_vm2, %v1254_v22  ;;  %1275 = vpow2.f32 %v955_v63  ;;  %v902_v26 = vpop.xlane.xlu1 %901 }
 0x357   : > { %v1258_v27 = vpop.eup %1257  ;;  %1002 = vst.msk [vmem:[%s1492_s9] sm:$0xff] %vm1001_vm2, %v1256_v5  ;;  %1277 = vpow2.f32 %v961_v23  ;;  %v963_v28 = vmul.f32 1.442695, %v934_v24  ;;  %v935_v29 = vsub.f32 0.0, %v919_v25  ;;  %v920_v30 = vadd.f32 %v1473_v18, %v902_v26 }
 0x358   : > { %v1260_v31 = vpop.eup %1259  ;;  %v973_v32 = vadd.f32 1.0, %v1258_v27 }
 0x359   : > { %v1262_v33 = vpop.eup %1261  ;;  %v974_v34 = vadd.f32 1.0, %v1260_v31  ;;  %1279 = vpow2.f32 %v963_v28  ;;  %v965_v35 = vmul.f32 1.442695, %v935_v29  ;;  %v936_v36 = vsub.f32 0.0, %v920_v30 }
 0x35a   : > { %v1264_v37 = vpop.eup %1263  ;;  %1005 = vst.msk [vmem:[%s1492_s9 + $0x18] sm:$0xff] %vm1001_vm2, %v1262_v33  ;;  %1281 = vrcp.f32 %v973_v32 }
 0x35b   : > { %v1266_v38 = vpop.eup %1265  ;;  %1003 = vst.msk [vmem:[%s1492_s9 + $0x8] sm:$0xff] %vm1001_vm2, %v1264_v37  ;;  %1283 = vrcp.f32 %v974_v34  ;;  %v967_v39 = vmul.f32 1.442695, %v936_v36 }
 0x35c   : > { %v1268_v40 = vpop.eup %1267  ;;  %v979_v18 = vadd.f32 1.0, %v1266_v38  ;;  %1285 = vpow2.f32 %v965_v35 }
 0x35d   : > { %v1270_v41 = vpop.eup %1269  ;;  %v980_v42 = vadd.f32 1.0, %v1268_v40  ;;  %1287 = vpow2.f32 %v967_v39 }
 0x35e   : > { %v1272_v43 = vpop.eup %1271  ;;  %1289 = vrcp.f32 %v979_v18  ;;  %v977_v44 = vadd.f32 1.0, %v1270_v41 }
 0x35f   : > { %v1274_v45 = vpop.eup %1273  ;;  %1008 = vst.msk [vmem:[%s1492_s9 + $0x30] sm:$0xff] %vm1001_vm2, %v1272_v43  ;;  %1291 = vrcp.f32 %v980_v42 }
 0x360   : > { %v1276_v46 = vpop.eup %1275  ;;  %1009 = vst.msk [vmem:[%s1492_s9 + $0x38] sm:$0xff] %vm1001_vm2, %v1274_v45  ;;  %1293 = vrcp.f32 %v977_v44 }
 0x361   : > { %v1278_v47 = vpop.eup %1277  ;;  %v978_v48 = vadd.f32 1.0, %v1276_v46 }
 0x362   : > { %v981_v49 = vadd.f32 1.0, %v1278_v47 }
 0x363   : > { %v1280_v50 = vpop.eup %1279  ;;  %1295 = vrcp.f32 %v978_v48 }
 0x364   : > { %v1282_v51 = vpop.eup %1281  ;;  %1297 = vrcp.f32 %v981_v49  ;;  %v982_v52 = vadd.f32 1.0, %v1280_v50 }
 0x365   : > { %v1284_v53 = vpop.eup %1283  ;;  %1006 = vst.msk [vmem:[%s1492_s9 + $0x20] sm:$0xff] %vm1001_vm2, %v1282_v51 }
 0x366   : > { %v1286_v54 = vpop.eup %1285  ;;  %1007 = vst.msk [vmem:[%s1492_s9 + $0x28] sm:$0xff] %vm1001_vm2, %v1284_v53  ;;  %1299 = vrcp.f32 %v982_v52 }
 0x367   : > { %v1288_v55 = vpop.eup %1287  ;;  %v983_v56 = vadd.f32 1.0, %v1286_v54 }
 0x368   : > { %v1290_v57 = vpop.eup %1289  ;;  %v984_v58 = vadd.f32 1.0, %v1288_v55 }
 0x369   : > { %v1292_v59 = vpop.eup %1291  ;;  %1012 = vst.msk [vmem:[%s1492_s9 + $0x50] sm:$0xff] %vm1001_vm2, %v1290_v57  ;;  %1301 = vrcp.f32 %v983_v56 }
 0x36a   : > { %v1294_v60 = vpop.eup %1293  ;;  %1013 = vst.msk [vmem:[%s1492_s9 + $0x58] sm:$0xff] %vm1001_vm2, %v1292_v59  ;;  %1303 = vrcp.f32 %v984_v58 }
 0x36b   : > { %1010 = vst.msk [vmem:[%s1492_s9 + $0x40] sm:$0xff] %vm1001_vm2, %v1294_v60 }
 0x36d   : > { %v1296_v61 = vpop.eup %1295 }
 0x36e   : > { %v1298_v62 = vpop.eup %1297  ;;  %1011 = vst.msk [vmem:[%s1492_s9 + $0x48] sm:$0xff] %vm1001_vm2, %v1296_v61 }
 0x36f   : > { %1014 = vst.msk [vmem:[%s1492_s9 + $0x60] sm:$0xff] %vm1001_vm2, %v1298_v62 }
 0x370   : > { %v1300_v0 = vpop.eup %1299 }
 0x371   : > { %1015 = vst.msk [vmem:[%s1492_s9 + $0x68] sm:$0xff] %vm1001_vm2, %v1300_v0 }
 0x373   : > { %v1302_v1 = vpop.eup %1301 }
 0x374   : > { %v1304_v2 = vpop.eup %1303  ;;  %1016 = vst.msk [vmem:[%s1492_s9 + $0x70] sm:$0xff] %vm1001_vm2, %v1302_v1 }
 0x375   : > { %1017 = vst.msk [vmem:[%s1492_s9 + $0x78] sm:$0xff] %vm1001_vm2, %v1304_v2 }
 0x376 PF: > { %s18_s26 = sadd.s32 1, %s1311_s26  }
 0x377   : > { %p15_p4 = scmp.ge.s32.totalorder %s18_s26, 4  }
 0x379   :  { %17 = sbr.rel (!%p15_p4) target bundleno = 2 (0x2), region = 80 }

</bundles_post_ra>
